<compile_context>
chip_gen: v5e
topology: v5e:2x2
jax: 0.10.0
libtpu: 0.0.40
codegen_flags: <defaults>
</compile_context>

<pallas_src>
import functools

import jax
import jax.numpy as jnp
from jax import lax
from jax.experimental import pallas as pl
from jax.experimental.pallas import tpu as pltpu

INPUT_DIM = 4
HIDDEN_DIM = 32
OUT_DIM = 4
BIAS_LANE = HIDDEN_DIM          # lane 32 carries the fc2 bias / the ReLU-safe 1.0
SLAB_ROWS = INPUT_DIM + 1 + OUT_DIM   # 9: w1 rows, b1 row, w2^T rows
SLAB_COLS = 128                 # full vreg lane width; lanes 33..127 are zero


def _dwl_kernel(slab_ref, alphas_ref, out_ref, *, targets):
    """fc1 -> ReLU -> fc2 -> sigmoid -> diff-adjust -> clamp, all on VPU/EUP.

    slab_ref   : VMEM (9, 128)  rows 0..3 : w1 (4,32) in lanes 0..31, rest 0
                                row  4    : b1 in lanes 0..31, lane 32 = 1.0
                                rows 5..8 : w2^T (4,32) in lanes 0..31,
                                            lane 32 = b2[j], rest 0
    alphas_ref : VMEM (N, 4)    N learners x [alpha_dc, alpha_ac,
                                              alpha_dc_1d, alpha_ac_1d]
    out_ref    : VMEM (N, 4)    adjusted + clamped alphas
    targets    : trace-time Python floats (ts, ts, tc, tc)
    """
    # fc1 + ReLU: four (N,1) x (1,128) FMAs.  Lane 32 of h stays at exactly
    # 1.0 (w1 rows are 0 there, b1 row is 1.0) and acts as fc2's bias input.
    h = (alphas_ref[:, 0:1] * slab_ref[0:1, :]
         + alphas_ref[:, 1:2] * slab_ref[1:2, :]
         + alphas_ref[:, 2:3] * slab_ref[2:3, :]
         + alphas_ref[:, 3:4] * slab_ref[3:4, :]
         + slab_ref[4:5, :])
    h = jnp.maximum(h, 0.0)                                        # (N, 128)

    # fc2 (+ bias via lane 32) as four independent lane reduces, then sigmoid.
    # Keeping the four outputs as separate (N,1) vectors means s[0] / s[2] are
    # directly available for the diff terms - no vector->scalar extraction.
    s = [
        jax.nn.sigmoid(
            jnp.sum(h * slab_ref[5 + j:6 + j, :], axis=1, keepdims=True))
        for j in range(OUT_DIM)
    ]                                                              # 4 x (N, 1)

    # diff-adjust + clamp: rows 0/1 use (target_spat - s[0]), rows 2/3 use
    # (target_channel - s[2]).  targets[j] is a compile-time constant.
    dup = (0, 0, 2, 2)
    for j in range(OUT_DIM):
        out_ref[:, j:j + 1] = jnp.clip(
            s[j] + (targets[j] - s[dup[j]]) * 0.1, 0.0, 1.0)


def pack_dwl_params(w1, b1, w2, b2):
    """Pack fc1/fc2 parameters into one (9, 128) f32 slab.  Call ONCE, reuse.

    w1: (4, 32) = fc1.weight.T, b1: (32,), w2: (32, 4) = fc2.weight.T, b2: (4,).
    Padding lanes 33..127 are exact zeros (required: they feed the ReLU and
    the fc2 lane reduces).
    """
    w1 = jnp.asarray(w1, jnp.float32)
    b1 = jnp.asarray(b1, jnp.float32)
    w2 = jnp.asarray(w2, jnp.float32)
    b2 = jnp.asarray(b2, jnp.float32)
    slab = jnp.zeros((SLAB_ROWS, SLAB_COLS), jnp.float32)
    slab = slab.at[0:INPUT_DIM, 0:HIDDEN_DIM].set(w1)
    slab = slab.at[INPUT_DIM, 0:HIDDEN_DIM].set(b1)
    slab = slab.at[INPUT_DIM, BIAS_LANE].set(1.0)
    slab = slab.at[INPUT_DIM + 1:, 0:HIDDEN_DIM].set(w2.T)
    slab = slab.at[INPUT_DIM + 1:, BIAS_LANE].set(b2)
    return slab


def _cost_estimate(batch):
    per = 2 * INPUT_DIM * HIDDEN_DIM + 2 * HIDDEN_DIM * OUT_DIM + 8 * OUT_DIM
    return pl.CostEstimate(
        flops=per * batch,
        transcendentals=4 * batch,
        bytes_accessed=SLAB_ROWS * SLAB_COLS * 4 + 2 * 4 * INPUT_DIM * batch,
    )


def dwl_batched(alphas_b, slab,
                target_spat_loss=2.0, target_channel_loss=2.0,
                block_b=None):
    """Run B DynamicWeightLearner forwards in one pallas_call.

    alphas_b: (B, 4) f32; slab: (9, 128) from pack_dwl_params (packed once).
    Returns (B, 4) adjusted, clamped alphas.
    """
    alphas_b = jnp.asarray(alphas_b, jnp.float32)
    B = alphas_b.shape[0]
    if block_b is None:
        block_b = 8 if (B % 8 == 0 and B > 8) else B
    assert B % block_b == 0

    ts = float(target_spat_loss)
    tc = float(target_channel_loss)
    kernel = functools.partial(_dwl_kernel, targets=(ts, ts, tc, tc))

    return pl.pallas_call(
        kernel,
        out_shape=jax.ShapeDtypeStruct((B, OUT_DIM), jnp.float32),
        grid_spec=pltpu.PrefetchScalarGridSpec(
            num_scalar_prefetch=0,
            grid=(B // block_b,),
            in_specs=[
                pl.BlockSpec((SLAB_ROWS, SLAB_COLS), lambda i: (0, 0)),
                pl.BlockSpec((block_b, INPUT_DIM), lambda i: (i, 0)),
            ],
            out_specs=pl.BlockSpec((block_b, OUT_DIM), lambda i: (i, 0)),
        ),
        compiler_params=pltpu.CompilerParams(
            dimension_semantics=("parallel",)),
        cost_estimate=_cost_estimate(B),
    )(slab, alphas_b)


def dynamic_weight_learner_packed(alphas, slab,
                                  target_spat_loss=2.0,
                                  target_channel_loss=2.0):
    """Single-learner (module-faithful) forward.  alphas: (4,) f32.

    Returns a (4,) array [alpha_dc_new, alpha_ac_new, alpha_dc_1d_new,
    alpha_ac_1d_new] (equivalent to the module's 4-tuple of scalars)."""
    alphas = jnp.asarray(alphas, jnp.float32).reshape(1, INPUT_DIM)
    out = dwl_batched(alphas, slab, target_spat_loss, target_channel_loss)
    return out.reshape(OUT_DIM)


def dynamic_weight_learner(alphas, w1, b1, w2, b2,
                           target_spat_loss=2.0, target_channel_loss=2.0):
    """Convenience wrapper.  Prefer pack_dwl_params() once + *_packed per step."""
    slab = pack_dwl_params(w1, b1, w2, b2)
    return dynamic_weight_learner_packed(alphas, slab,
                                         target_spat_loss, target_channel_loss)


# ----------------------------- test harness ---------------------------------

def _xavier_uniform(key, shape):
    fan_out, fan_in = shape
    bound = (6.0 / (fan_in + fan_out)) ** 0.5
    return jax.random.uniform(key, shape, jnp.float32, -bound, bound)


def _linear_bias(key, fan_in, fan_out):
    bound = 1.0 / (fan_in ** 0.5)
    return jax.random.uniform(key, (fan_out,), jnp.float32, -bound, bound)


def _reference(alphas, w1, b1, w2, b2, tgt_s=2.0, tgt_c=2.0):
    x = alphas[None, :]                                             # (1, 4)
    h = jnp.maximum(jnp.dot(x, w1, precision=lax.Precision.HIGHEST) + b1, 0.0)
    out = jax.nn.sigmoid(jnp.dot(h, w2, precision=lax.Precision.HIGHEST) + b2)[0]
    sd = tgt_s - out[0]
    cd = tgt_c - out[2]
    new = out + jnp.array([sd, sd, cd, cd]) * 0.1
    return jnp.clip(new, 0.0, 1.0)


if __name__ == "__main__":
    key = jax.random.PRNGKey(0)
    k1, k2, k3, k4, k5, k6 = jax.random.split(key, 6)

    # fc1: Linear(4, 32); fc2: Linear(32, 4)  (PyTorch stores weights as (out, in))
    fc1_w = _xavier_uniform(k1, (HIDDEN_DIM, INPUT_DIM))   # (32, 4)
    fc1_b = _linear_bias(k2, INPUT_DIM, HIDDEN_DIM)        # (32,)
    fc2_w = _xavier_uniform(k3, (OUT_DIM, HIDDEN_DIM))     # (4, 32)
    fc2_b = _linear_bias(k4, HIDDEN_DIM, OUT_DIM)          # (4,)

    w1 = fc1_w.T   # (4, 32)
    w2 = fc2_w.T   # (32, 4)

    # Pack parameters ONCE (hoisted out of the per-step path).
    slab = pack_dwl_params(w1, fc1_b, w2, fc2_b)

    # --- single-learner (module-faithful) call --------------------------------
    alphas = jax.random.uniform(k5, (INPUT_DIM,), jnp.float32, 0.0, 3.0)
    out = jax.block_until_ready(
        dynamic_weight_learner_packed(alphas, slab, 2.0, 2.0))
    ref = _reference(alphas, w1, fc1_b, w2, fc2_b)
    assert jnp.allclose(out, ref, atol=1e-5, rtol=1e-5), (out, ref)

    # --- batched call (B learners, one pallas_call, grid over B) --------------
    B = 16
    alphas_b = jax.random.uniform(k6, (B, INPUT_DIM), jnp.float32, 0.0, 3.0)
    out_b = jax.block_until_ready(dwl_batched(alphas_b, slab, 2.0, 2.0))
    ref_b = jax.vmap(lambda a: _reference(a, w1, fc1_b, w2, fc2_b))(alphas_b)
    assert out_b.shape == (B, OUT_DIM)
    assert jnp.allclose(out_b, ref_b, atol=1e-5, rtol=1e-5), (out_b, ref_b)

    print("KERNEL_OK")
</pallas_src>

<mosaic_0001>
module attributes {stable_mosaic.version = 11 : i64} {
  func.func @_dwl_kernel(%arg0: i32, %arg1: memref<9x128xf32, #tpu.memory_space<vmem>>, %arg2: memref<1x4xf32, #tpu.memory_space<vmem>>, %arg3: memref<1x4xf32, #tpu.memory_space<vmem>>) attributes {dimension_semantics = [#tpu.dimension_semantics<parallel>], iteration_bounds = array<i64: 1>, scalar_prefetch = 0 : i64, scratch_operands = 0 : i64, tpu.core_type = #tpu.core_type<tc>, window_params = [{pipeline_mode = #tpu.pipeline_mode<synchronous>, transform_indices = @transform_0, window_bounds = array<i64: 9, 128>}, {transform_indices = @transform_1, window_bounds = array<i64: 1, 4>}, {transform_indices = @transform_2, window_bounds = array<i64: 1, 4>}]} {
    %c0 = arith.constant 0 : index
    %c0_0 = arith.constant 0 : index
    %0 = vector.load %arg2[%c0, %c0_0] : memref<1x4xf32, #tpu.memory_space<vmem>>, vector<1x1xf32>
    %c0_1 = arith.constant 0 : index
    %c0_2 = arith.constant 0 : index
    %1 = vector.load %arg1[%c0_1, %c0_2] : memref<9x128xf32, #tpu.memory_space<vmem>>, vector<1x128xf32>
    %2 = vector.broadcast %0 : vector<1x1xf32> to vector<1x128xf32>
    %3 = arith.mulf %2, %1 : vector<1x128xf32>
    %c0_3 = arith.constant 0 : index
    %c1 = arith.constant 1 : index
    %4 = vector.load %arg2[%c0_3, %c1] : memref<1x4xf32, #tpu.memory_space<vmem>>, vector<1x1xf32>
    %c1_4 = arith.constant 1 : index
    %c0_5 = arith.constant 0 : index
    %5 = vector.load %arg1[%c1_4, %c0_5] : memref<9x128xf32, #tpu.memory_space<vmem>>, vector<1x128xf32>
    %6 = vector.broadcast %4 : vector<1x1xf32> to vector<1x128xf32>
    %7 = arith.mulf %6, %5 : vector<1x128xf32>
    %8 = arith.addf %3, %7 : vector<1x128xf32>
    %c0_6 = arith.constant 0 : index
    %c2 = arith.constant 2 : index
    %9 = vector.load %arg2[%c0_6, %c2] : memref<1x4xf32, #tpu.memory_space<vmem>>, vector<1x1xf32>
    %c2_7 = arith.constant 2 : index
    %c0_8 = arith.constant 0 : index
    %10 = vector.load %arg1[%c2_7, %c0_8] : memref<9x128xf32, #tpu.memory_space<vmem>>, vector<1x128xf32>
    %11 = vector.broadcast %9 : vector<1x1xf32> to vector<1x128xf32>
    %12 = arith.mulf %11, %10 : vector<1x128xf32>
    %13 = arith.addf %8, %12 : vector<1x128xf32>
    %c0_9 = arith.constant 0 : index
    %c3 = arith.constant 3 : index
    %14 = vector.load %arg2[%c0_9, %c3] : memref<1x4xf32, #tpu.memory_space<vmem>>, vector<1x1xf32>
    %c3_10 = arith.constant 3 : index
    %c0_11 = arith.constant 0 : index
    %15 = vector.load %arg1[%c3_10, %c0_11] : memref<9x128xf32, #tpu.memory_space<vmem>>, vector<1x128xf32>
    %16 = vector.broadcast %14 : vector<1x1xf32> to vector<1x128xf32>
    %17 = arith.mulf %16, %15 : vector<1x128xf32>
    %18 = arith.addf %13, %17 : vector<1x128xf32>
    %c4 = arith.constant 4 : index
    %c0_12 = arith.constant 0 : index
    %19 = vector.load %arg1[%c4, %c0_12] : memref<9x128xf32, #tpu.memory_space<vmem>>, vector<1x128xf32>
    %20 = arith.addf %18, %19 : vector<1x128xf32>
    %cst = arith.constant 0.000000e+00 : f32
    %21 = vector.broadcast %cst : f32 to vector<1x128xf32>
    %22 = arith.maximumf %20, %21 : vector<1x128xf32>
    %c5 = arith.constant 5 : index
    %c0_13 = arith.constant 0 : index
    %23 = vector.load %arg1[%c5, %c0_13] : memref<9x128xf32, #tpu.memory_space<vmem>>, vector<1x128xf32>
    %24 = arith.mulf %22, %23 : vector<1x128xf32>
    %cst_14 = arith.constant dense<0.000000e+00> : vector<1xf32>
    %25 = vector.multi_reduction <add>, %24, %cst_14 [1] : vector<1x128xf32> to vector<1xf32>
    %26 = vector.shape_cast %25 : vector<1xf32> to vector<1x1xf32>
    %27 = arith.negf %26 : vector<1x1xf32>
    %28 = math.exp %27 : vector<1x1xf32>
    %cst_15 = arith.constant 1.000000e+00 : f32
    %29 = vector.broadcast %cst_15 : f32 to vector<1x1xf32>
    %30 = arith.addf %29, %28 : vector<1x1xf32>
    %31 = arith.divf %29, %30 : vector<1x1xf32>
    %c6 = arith.constant 6 : index
    %c0_16 = arith.constant 0 : index
    %32 = vector.load %arg1[%c6, %c0_16] : memref<9x128xf32, #tpu.memory_space<vmem>>, vector<1x128xf32>
    %33 = arith.mulf %22, %32 : vector<1x128xf32>
    %cst_17 = arith.constant dense<0.000000e+00> : vector<1xf32>
    %34 = vector.multi_reduction <add>, %33, %cst_17 [1] : vector<1x128xf32> to vector<1xf32>
    %35 = vector.shape_cast %34 : vector<1xf32> to vector<1x1xf32>
    %36 = arith.negf %35 : vector<1x1xf32>
    %37 = math.exp %36 : vector<1x1xf32>
    %cst_18 = arith.constant 1.000000e+00 : f32
    %38 = vector.broadcast %cst_18 : f32 to vector<1x1xf32>
    %39 = arith.addf %38, %37 : vector<1x1xf32>
    %40 = arith.divf %38, %39 : vector<1x1xf32>
    %c7 = arith.constant 7 : index
    %c0_19 = arith.constant 0 : index
    %41 = vector.load %arg1[%c7, %c0_19] : memref<9x128xf32, #tpu.memory_space<vmem>>, vector<1x128xf32>
    %42 = arith.mulf %22, %41 : vector<1x128xf32>
    %cst_20 = arith.constant dense<0.000000e+00> : vector<1xf32>
    %43 = vector.multi_reduction <add>, %42, %cst_20 [1] : vector<1x128xf32> to vector<1xf32>
    %44 = vector.shape_cast %43 : vector<1xf32> to vector<1x1xf32>
    %45 = arith.negf %44 : vector<1x1xf32>
    %46 = math.exp %45 : vector<1x1xf32>
    %cst_21 = arith.constant 1.000000e+00 : f32
    %47 = vector.broadcast %cst_21 : f32 to vector<1x1xf32>
    %48 = arith.addf %47, %46 : vector<1x1xf32>
    %49 = arith.divf %47, %48 : vector<1x1xf32>
    %c8 = arith.constant 8 : index
    %c0_22 = arith.constant 0 : index
    %50 = vector.load %arg1[%c8, %c0_22] : memref<9x128xf32, #tpu.memory_space<vmem>>, vector<1x128xf32>
    %51 = arith.mulf %22, %50 : vector<1x128xf32>
    %cst_23 = arith.constant dense<0.000000e+00> : vector<1xf32>
    %52 = vector.multi_reduction <add>, %51, %cst_23 [1] : vector<1x128xf32> to vector<1xf32>
    %53 = vector.shape_cast %52 : vector<1xf32> to vector<1x1xf32>
    %54 = arith.negf %53 : vector<1x1xf32>
    %55 = math.exp %54 : vector<1x1xf32>
    %cst_24 = arith.constant 1.000000e+00 : f32
    %56 = vector.broadcast %cst_24 : f32 to vector<1x1xf32>
    %57 = arith.addf %56, %55 : vector<1x1xf32>
    %58 = arith.divf %56, %57 : vector<1x1xf32>
    %cst_25 = arith.constant 2.000000e+00 : f32
    %59 = vector.broadcast %cst_25 : f32 to vector<1x1xf32>
    %60 = arith.subf %59, %31 : vector<1x1xf32>
    %cst_26 = arith.constant 1.000000e-01 : f32
    %61 = vector.broadcast %cst_26 : f32 to vector<1x1xf32>
    %62 = arith.mulf %60, %61 : vector<1x1xf32>
    %63 = arith.addf %31, %62 : vector<1x1xf32>
    %cst_27 = arith.constant 0.000000e+00 : f32
    %cst_28 = arith.constant 1.000000e+00 : f32
    %64 = vector.broadcast %cst_27 : f32 to vector<1x1xf32>
    %65 = arith.maximumf %64, %63 : vector<1x1xf32>
    %66 = vector.broadcast %cst_28 : f32 to vector<1x1xf32>
    %67 = arith.minimumf %66, %65 : vector<1x1xf32>
    %c0_29 = arith.constant 0 : index
    %c0_30 = arith.constant 0 : index
    %68 = vector.load %arg3[%c0_29, %c0_30] : memref<1x4xf32, #tpu.memory_space<vmem>>, vector<1x1xf32>
    tpu.vector_store %arg3[%c0_29, %c0_30], %67 {strides = array<i32>} : memref<1x4xf32, #tpu.memory_space<vmem>>, vector<1x1xf32>,
    %cst_31 = arith.constant 2.000000e+00 : f32
    %69 = vector.broadcast %cst_31 : f32 to vector<1x1xf32>
    %70 = arith.subf %69, %31 : vector<1x1xf32>
    %cst_32 = arith.constant 1.000000e-01 : f32
    %71 = vector.broadcast %cst_32 : f32 to vector<1x1xf32>
    %72 = arith.mulf %70, %71 : vector<1x1xf32>
    %73 = arith.addf %40, %72 : vector<1x1xf32>
    %cst_33 = arith.constant 0.000000e+00 : f32
    %cst_34 = arith.constant 1.000000e+00 : f32
    %74 = vector.broadcast %cst_33 : f32 to vector<1x1xf32>
    %75 = arith.maximumf %74, %73 : vector<1x1xf32>
    %76 = vector.broadcast %cst_34 : f32 to vector<1x1xf32>
    %77 = arith.minimumf %76, %75 : vector<1x1xf32>
    %c0_35 = arith.constant 0 : index
    %c1_36 = arith.constant 1 : index
    %78 = vector.load %arg3[%c0_35, %c1_36] : memref<1x4xf32, #tpu.memory_space<vmem>>, vector<1x1xf32>
    tpu.vector_store %arg3[%c0_35, %c1_36], %77 {strides = array<i32>} : memref<1x4xf32, #tpu.memory_space<vmem>>, vector<1x1xf32>,
    %cst_37 = arith.constant 2.000000e+00 : f32
    %79 = vector.broadcast %cst_37 : f32 to vector<1x1xf32>
    %80 = arith.subf %79, %49 : vector<1x1xf32>
    %cst_38 = arith.constant 1.000000e-01 : f32
    %81 = vector.broadcast %cst_38 : f32 to vector<1x1xf32>
    %82 = arith.mulf %80, %81 : vector<1x1xf32>
    %83 = arith.addf %49, %82 : vector<1x1xf32>
    %cst_39 = arith.constant 0.000000e+00 : f32
    %cst_40 = arith.constant 1.000000e+00 : f32
    %84 = vector.broadcast %cst_39 : f32 to vector<1x1xf32>
    %85 = arith.maximumf %84, %83 : vector<1x1xf32>
    %86 = vector.broadcast %cst_40 : f32 to vector<1x1xf32>
    %87 = arith.minimumf %86, %85 : vector<1x1xf32>
    %c0_41 = arith.constant 0 : index
    %c2_42 = arith.constant 2 : index
    %88 = vector.load %arg3[%c0_41, %c2_42] : memref<1x4xf32, #tpu.memory_space<vmem>>, vector<1x1xf32>
    tpu.vector_store %arg3[%c0_41, %c2_42], %87 {strides = array<i32>} : memref<1x4xf32, #tpu.memory_space<vmem>>, vector<1x1xf32>,
    %cst_43 = arith.constant 2.000000e+00 : f32
    %89 = vector.broadcast %cst_43 : f32 to vector<1x1xf32>
    %90 = arith.subf %89, %49 : vector<1x1xf32>
    %cst_44 = arith.constant 1.000000e-01 : f32
    %91 = vector.broadcast %cst_44 : f32 to vector<1x1xf32>
    %92 = arith.mulf %90, %91 : vector<1x1xf32>
    %93 = arith.addf %58, %92 : vector<1x1xf32>
    %cst_45 = arith.constant 0.000000e+00 : f32
    %cst_46 = arith.constant 1.000000e+00 : f32
    %94 = vector.broadcast %cst_45 : f32 to vector<1x1xf32>
    %95 = arith.maximumf %94, %93 : vector<1x1xf32>
    %96 = vector.broadcast %cst_46 : f32 to vector<1x1xf32>
    %97 = arith.minimumf %96, %95 : vector<1x1xf32>
    %c0_47 = arith.constant 0 : index
    %c3_48 = arith.constant 3 : index
    %98 = vector.load %arg3[%c0_47, %c3_48] : memref<1x4xf32, #tpu.memory_space<vmem>>, vector<1x1xf32>
    tpu.vector_store %arg3[%c0_47, %c3_48], %97 {strides = array<i32>} : memref<1x4xf32, #tpu.memory_space<vmem>>, vector<1x1xf32>,
    return
  }
  func.func @transform_0(%arg0: i32) -> (i32, i32) {
    %c0_i32 = arith.constant 0 : i32
    %c0_i32_0 = arith.constant 0 : i32
    %c0_i32_1 = arith.constant 0 : i32
    return %c0_i32, %c0_i32_0 : i32, i32
  }
  func.func @transform_1(%arg0: i32) -> (i32, i32) {
    %c0_i32 = arith.constant 0 : i32
    %c0_i32_0 = arith.constant 0 : i32
    return %arg0, %c0_i32 : i32, i32
  }
  func.func @transform_2(%arg0: i32) -> (i32, i32) {
    %c0_i32 = arith.constant 0 : i32
    %c0_i32_0 = arith.constant 0 : i32
    return %arg0, %c0_i32 : i32, i32
  }
}

</mosaic_0001>

<bundles_post_ra>
// kernel: tpu_custom_call.1
= control target key start
LH: loop header
LB: loop body
LE: loop exit
PB: predicated region body
PF: predicated region fallthrough
CT: control target
= control target key end

     0   :  { %7 = vsyncpa [#allocation3], 0  ;;  %s362_s0 = inlined_call_operand.hbm [shape: f32[9,128], index: 0, kind: input, shape index: {}]   ;;  %s363_s1 = inlined_call_operand.hbm [shape: f32[1,4], index: 1, kind: input, shape index: {}]   ;;  %s364_s2 = inlined_call_operand.hbm [shape: f32[1,4], index: 2, kind: output, shape index: {}]  }
   0x1   :  { %8 = vsyncpa [#allocation6], 0 }
   0x2   :  { %9 = vsyncpa [#allocation4], 0  ;;  %s14_s11 = sshll.u32 %s362_s0, 4  ;;  %s329_s12 = smov [#allocation2]   ;;  %s15_s11 = int_to_ptr.hbm [resolvable:$true] %s14_s11 }
   0x3   :  { %s16_s13 = sshll.u32 %s329_s12, 4  ;;  %s28_s16 = sshll.u32 %s363_s1, 4  ;;  %s17_s13 = int_to_ptr.vmem [resolvable:$true] %s16_s13  ;;  %s29_s16 = int_to_ptr.hbm [resolvable:$true] %s28_s16 }
   0x4   :  { %s330_s17 = smov 128   ;;  %s331_s18 = smov 8  }
   0x5   :  { %22 = dma.hbm_to_vmem [thread:$0]  %s15_s11, 256, %s17_s13, [#allocation3], %s330_s17, %s330_s17, %s331_s18  }
   0x6   :  { %s332_s19 = smov [#allocation5]  }
   0x7   :  { %s30_s20 = sshll.u32 %s332_s19, 4  ;;  %s31_s20 = int_to_ptr.vmem [resolvable:$true] %s30_s20 }
   0x8   :  { %33 = dma.hbm_to_vmem [thread:$0]  %s29_s16, 16, %s31_s20, [#allocation6]  }
   0x9   :  { %323 = dma.done.wait [#allocation3], 256  }
   0xa   :  { %324 = vsyncadd [#allocation3], 4294967040 }
   0xb   :  { %325 = dma.done.wait [#allocation6], 16  }
   0xc   :  { %326 = vsyncadd [#allocation6], 4294967280  ;;  %v333_v0 = vmov 0   ;;  %v334_v1 = vmov 2   ;;  %v42_v2 = vld [vmem:[#allocation5] sm:$0x1] }
   0xd   :  { %230 = vset.pattern.permute.xlu0 %v333_v0  ;;  %232 = vset.pattern.permute.xlu1 %v334_v1  ;;  %v335_v3 = vmov 1   ;;  %v336_v4 = vmov 3   ;;  %v43_v8 = vld [vmem:[#allocation2] sm:$0x1]  ;;  %v51_v9 = vld [vmem:[#allocation2 + $0x1] sm:$0x1] }
   0xe   :  { %46 = vperm.xlu0 %230, %v42_v2   ;;  %61 = vperm.xlu1 %232, %v42_v2   ;;  %v59_v15 = vld [vmem:[#allocation2 + $0x2] sm:$0x1]  ;;  %v67_v16 = vld [vmem:[#allocation2 + $0x3] sm:$0x1]  ;;  %v75_v23 = vld [vmem:[#allocation2 + $0x4] sm:$0x1] }
   0xf   :  { %v103_v26 = vld [vmem:[#allocation2 + $0x6] sm:$0x1]  ;;  %v78_v27 = vld [vmem:[#allocation2 + $0x5] sm:$0x1]  ;;  %vm80_vm0 = vcmask 1040384   ;;  %vm180_vm13 = vcmask 0  }
  0x10   :  { %v127_v33 = vld [vmem:[#allocation2 + $0x7] sm:$0x1]  ;;  %v151_v36 = vld [vmem:[#allocation2 + $0x8] sm:$0x1]  ;;  %vm185_vm14 = vcmask 8200   ;;  %s337_s0 = smov [#allocation7]  }
  0x11   :  { %s204_s1 = sshll.u32 %s337_s0, 4  ;;  %s206_s23 = sshll.u32 %s364_s2, 4  ;;  %s205_s1 = int_to_ptr.vmem [resolvable:$true] %s204_s1  ;;  %s207_s23 = int_to_ptr.hbm [resolvable:$true] %s206_s23 }
  0x16   :  { %231 = vset.pattern.permute.xlu0 %v335_v3  ;;  %233 = vset.pattern.permute.xlu1 %v336_v4 }
  0x17   :  { %53 = vperm.xlu0 %231, %v42_v2   ;;  %69 = vperm.xlu1 %233, %v42_v2  }
  0x1f   :  { %234 = vset.pattern.permute.xlu0 %v336_v4 }
  0x80   :  { %v47_v5 = vpop.permute.xlu0 %46  ;;  %v62_v6 = vpop.permute.xlu1 %61 }
  0x81   :  { %v49_v7 = vperm.slane %v47_v5, 0  ;;  %v64_v12 = vperm.slane %v62_v6, 0 }
  0x83   :  { %v50_v17 = vmul.f32 %v49_v7, %v43_v8  ;;  %v65_v19 = vmul.f32 %v64_v12, %v59_v15 }
  0x89   :  { %v54_v10 = vpop.permute.xlu0 %53  ;;  %v70_v11 = vpop.permute.xlu1 %69 }
  0x8a   :  { %v56_v13 = vperm.slane %v54_v10, 0  ;;  %v72_v14 = vperm.slane %v70_v11, 0 }
  0x8c   :  { %v57_v18 = vmul.f32 %v56_v13, %v51_v9  ;;  %v73_v21 = vmul.f32 %v72_v14, %v67_v16 }
  0x8e   :  { %v58_v20 = vadd.f32 %v57_v18, %v50_v17 }
  0x90   :  { %v66_v22 = vadd.f32 %v65_v19, %v58_v20 }
  0x92   :  { %v74_v24 = vadd.f32 %v73_v21, %v66_v22 }
  0x94   :  { %v76_v25 = vadd.f32 %v75_v23, %v74_v24 }
  0x96   :  { %v77_v28 = vmax.f32 %v76_v25, 0.0 }
  0x98   :  { %v104_v29 = vmul.f32 %v103_v26, %v77_v28  ;;  %v79_v30 = vmul.f32 %v78_v27, %v77_v28  ;;  %v128_v34 = vmul.f32 %v127_v33, %v77_v28  ;;  %v152_v37 = vmul.f32 %v151_v36, %v77_v28 }
  0x9a   :  { %v105_v31 = vsel %vm80_vm0, %v104_v29, 0.0  ;;  %v81_v32 = vsel %vm80_vm0, %v79_v30, 0.0  ;;  %v129_v35 = vsel %vm80_vm0, %v128_v34, 0.0  ;;  %v153_v38 = vsel %vm80_vm0, %v152_v37, 0.0 }
  0x9b   :  { %106 = vadd.xlane.f32.xlu1 %v105_v31  ;;  %82 = vadd.xlane.f32.xlu2 %v81_v32 }
  0xa3   :  { %130 = vadd.xlane.f32.xlu2 %v129_v35 }
  0xab   :  { %154 = vadd.xlane.f32.xlu2 %v153_v38 }
 0x10e   :  { %v107_v39 = vpop.xlane.xlu1 %106  ;;  %v83_v40 = vpop.xlane.xlu2 %82 }
 0x10f   :  { %v218_v41 = vmul.f32 -1.442695, %v107_v39  ;;  %v217_v42 = vmul.f32 -1.442695, %v83_v40 }
 0x111   :  { %235 = vpow2.f32 %v218_v41 }
 0x112   :  { %237 = vpow2.f32 %v217_v42 }
 0x116   :  { %v131_v43 = vpop.xlane.xlu2 %130 }
 0x117   :  { %v236_v44 = vpop.eup %235  ;;  %v219_v45 = vmul.f32 -1.442695, %v131_v43 }
 0x118   :  { %v238_v46 = vpop.eup %237  ;;  %v111_v47 = vadd.f32 1.0, %v236_v44 }
 0x119   :  { %v87_v48 = vadd.f32 1.0, %v238_v46  ;;  %239 = vpow2.f32 %v219_v45 }
 0x11a   :  { %241 = vrcp.f32 %v111_v47  ;;  %vm117_vm4 = vweird.f32 %v111_v47  ;;  %v123_v4 = vand.u32 2147483648, %v111_v47  ;;  %v121_v7 = vand.u32 2147483647, %v111_v47 }
 0x11b   :  { %243 = vrcp.f32 %v87_v48  ;;  %v99_v60 = vand.u32 2147483648, %v87_v48  ;;  %v97_v62 = vand.u32 2147483647, %v87_v48  ;;  %vm93_vm2 = vweird.f32 %v87_v48 }
 0x11c   :  { %v124_v14 = vor.u32 1.1754944e-38, %v123_v4  ;;  %vm122_vm9 = vcmp.eq.f32.partialorder %v121_v7, 8.507059e+37 }
 0x11d   :  { %v100_v5 = vor.u32 1.1754944e-38, %v99_v60  ;;  %vm98_vm6 = vcmp.eq.f32.partialorder %v97_v62, 8.507059e+37 }
 0x11e   :  { %v155_v49 = vpop.xlane.xlu2 %154 }
 0x11f   :  { %v240_v50 = vpop.eup %239  ;;  %v220_v51 = vmul.f32 -1.442695, %v155_v49 }
 0x120   :  { %v242_v52 = vpop.eup %241  ;;  %v135_v53 = vadd.f32 1.0, %v240_v50 }
 0x121   :  { %v244_v54 = vpop.eup %243  ;;  %v113_v55 = vmul.f32 %v242_v52, %v111_v47  ;;  %245 = vpow2.f32 %v220_v51  ;;  %vm118_vm3 = vweird.f32 %v242_v52 }
 0x122   :  { %v89_v56 = vmul.f32 %v244_v54, %v87_v48  ;;  %247 = vrcp.f32 %v135_v53  ;;  %vm94_vm1 = vweird.f32 %v244_v54  ;;  %vm119_vm7 = vmor %vm117_vm4, %vm118_vm3  ;;  %v147_v13 = vand.u32 2147483648, %v135_v53 }
 0x123   :  { %v114_v57 = vsub.f32 1.0, %v113_v55  ;;  %vm95_vm5 = vmor %vm93_vm2, %vm94_vm1  ;;  %v145_v16 = vand.u32 2147483647, %v135_v53  ;;  %vm141_vm10 = vweird.f32 %v135_v53  ;;  %vm192_vm3 = vcmask 16400  }
 0x124   :  { %v90_v58 = vsub.f32 1.0, %v89_v56  ;;  %v148_v22 = vor.u32 1.1754944e-38, %v147_v13  ;;  %vm197_vm4 = vcmask 24600  }
 0x125   :  { %v115_v59 = vmul.f32 %v242_v52, %v114_v57  ;;  %vm146_vm12 = vcmp.eq.f32.partialorder %v145_v16, 8.507059e+37 }
 0x126   :  { %v91_v61 = vmul.f32 %v244_v54, %v90_v58 }
 0x127   :  { %v246_v63 = vpop.eup %245  ;;  %v116_v1 = vadd.f32 %v242_v52, %v115_v59 }
 0x128   :  { %v248_v0 = vpop.eup %247  ;;  %v92_v2 = vadd.f32 %v244_v54, %v91_v61  ;;  %v159_v3 = vadd.f32 1.0, %v246_v63 }
 0x129   :  { %v137_v6 = vmul.f32 %v248_v0, %v135_v53  ;;  %v120_v11 = vsel %vm119_vm7, %v242_v52, %v116_v1  ;;  %vm142_vm8 = vweird.f32 %v248_v0 }
 0x12a   :  { %v96_v8 = vsel %vm95_vm5, %v244_v54, %v92_v2  ;;  %249 = vrcp.f32 %v159_v3  ;;  %v125_v18 = vsel %vm122_vm9, %v124_v14, %v120_v11  ;;  %vm143_vm11 = vmor %vm141_vm10, %vm142_vm8  ;;  %v171_v31 = vand.u32 2147483648, %v159_v3 }
 0x12b   :  { %v101_v9 = vsel %vm98_vm6, %v100_v5, %v96_v8  ;;  %v138_v10 = vsub.f32 1.0, %v137_v6  ;;  %v169_v35 = vand.u32 2147483647, %v159_v3  ;;  %vm165_vm0 = vweird.f32 %v159_v3 }
 0x12c   :  { %v175_v12 = vsub.f32 2.0, %v101_v9  ;;  %v172_v39 = vor.u32 1.1754944e-38, %v171_v31 }
 0x12d   :  { %v139_v15 = vmul.f32 %v248_v0, %v138_v10  ;;  %vm170_vm2 = vcmp.eq.f32.partialorder %v169_v35, 8.507059e+37 }
 0x12e   :  { %v176_v17 = vmul.f32 0.1, %v175_v12 }
 0x12f   :  { %v140_v19 = vadd.f32 %v248_v0, %v139_v15 }
 0x130   :  { %v250_v20 = vpop.eup %249  ;;  %v177_v21 = vadd.f32 %v176_v17, %v101_v9  ;;  %v182_v23 = vadd.f32 %v176_v17, %v125_v18 }
 0x131   :  { %v161_v24 = vmul.f32 %v250_v20, %v159_v3  ;;  %v144_v25 = vsel %vm143_vm11, %v248_v0, %v140_v19  ;;  %vm166_vm15 = vweird.f32 %v250_v20 }
 0x132   :  { %v178_v26 = vmax.f32 %v177_v21, 0.0  ;;  %v149_v27 = vsel %vm146_vm12, %v148_v22, %v144_v25  ;;  %v183_v28 = vmax.f32 %v182_v23, 0.0  ;;  %vm167_vm1 = vmor %vm165_vm0, %vm166_vm15 }
 0x133   :  { %v162_v29 = vsub.f32 1.0, %v161_v24  ;;  %v187_v30 = vsub.f32 2.0, %v149_v27 }
 0x134   :  { %v179_v32 = vmin.f32 %v178_v26, 1.0  ;;  %v184_v33 = vmin.f32 %v183_v28, 1.0 }
 0x135   :  { %v163_v34 = vmul.f32 %v250_v20, %v162_v29  ;;  %v188_v36 = vmul.f32 0.1, %v187_v30 }
 0x136   :  { %181 = vst.msk [vmem:[#allocation7] sm:$0x1] %vm180_vm13, %v179_v32 }
 0x137   :  { %v164_v37 = vadd.f32 %v250_v20, %v163_v34  ;;  %186 = vst.msk [vmem:[#allocation7] sm:$0x1] %vm185_vm14, %v184_v33  ;;  %v189_v38 = vadd.f32 %v188_v36, %v149_v27 }
 0x139   :  { %v168_v40 = vsel %vm167_vm1, %v250_v20, %v164_v37  ;;  %v190_v41 = vmax.f32 %v189_v38, 0.0 }
 0x13a   :  { %v173_v42 = vsel %vm170_vm2, %v172_v39, %v168_v40 }
 0x13b   :  { %v191_v43 = vmin.f32 %v190_v41, 1.0  ;;  %v194_v44 = vadd.f32 %v188_v36, %v173_v42 }
 0x13d   :  { %193 = vst.msk [vmem:[#allocation7] sm:$0x1] %vm192_vm3, %v191_v43  ;;  %v195_v45 = vmax.f32 %v194_v44, 0.0 }
 0x13f   :  { %v196_v46 = vmin.f32 %v195_v45, 1.0 }
 0x141   :  { %198 = vst.msk [vmem:[#allocation7] sm:$0x1] %vm197_vm4, %v196_v46 }
 0x142   :  { %209 = dma.vmem_to_hbm [thread:$0]  %s205_s1, 16, %s207_s23, [#allocation4]  }
 0x143   :  { %327 = dma.done.wait [#allocation4], 16  }
 0x144   :  { %328 = vsyncadd [#allocation4], 4294967280 }
 0x145   :  { %214 = vsyncpa [#allocation3], 1 }
 0x146   :  { %215 = vsyncpa [#allocation6], 1 }
 0x147   :  { %216 = vsyncpa [#allocation4], 1 }

</bundles_post_ra>
